<compile_context>
chip_gen: v7x
topology: tpu7x:2x2x1
jax: 0.10.0
libtpu: 0.0.40
codegen_flags: <defaults>
</compile_context>

<pallas_src>
import math

import numpy as np
import jax
import jax.numpy as jnp
from jax.experimental import pallas as pl
from jax.experimental.pallas import tpu as pltpu


# ----------------------- parameter construction (plain numpy) ------------------

def transition(N):
    Q = np.arange(N, dtype=np.float64)
    R = (2 * Q + 1)[:, None]
    j, i = np.meshgrid(Q, Q)
    A = np.where(i < j, -1, (-1.0) ** (i - j + 1)) * R
    B = (-1.0) ** Q[:, None] * R
    return A, B


def bilinear_discretize(A, B, dt):
    # scipy.signal.cont2discrete(..., method='bilinear') == gbt with alpha=0.5:
    #   Ad = (I - dt/2*A)^{-1} (I + dt/2*A),  Bd = (I - dt/2*A)^{-1} (dt*B)
    N = A.shape[0]
    I = np.eye(N, dtype=np.float64)
    M1 = I - (dt / 2.0) * A
    Ad = np.linalg.solve(M1, I + (dt / 2.0) * A)
    Bd = np.linalg.solve(M1, dt * B)
    return Ad, Bd


def make_hippo_legt_params(N, dt):
    A, B = transition(N)
    Ad, Bd = bilinear_discretize(A, B, dt)
    Bd = Bd.squeeze(-1)  # (N,)
    # TODO(synk): eval_matrix (scipy.special.eval_legendre) is only used by
    # reconstruct(), not by forward(); omitted here.
    return Ad, Bd  # float64; cast where needed


def make_chunk_operators(Ad, Bd, T):
    """Precompute (float64 -> float32) the chunked-recurrence operators.

    V: (T, T*N)   row i, col-block k:  B @ (A^T)^(k-i)   for k >= i, else 0
    P: (N, T*N)   col-block k:         (A^T)^(k+1)
    """
    N = Ad.shape[0]
    A_T = np.asarray(Ad, dtype=np.float64).T
    B = np.asarray(Bd, dtype=np.float64)              # (N,)

    powers = [np.eye(N, dtype=np.float64)]
    for _ in range(T):
        powers.append(powers[-1] @ A_T)

    P = np.concatenate([powers[k + 1] for k in range(T)], axis=1)     # (N, T*N)
    bpow = np.stack([B @ powers[k] for k in range(T)], axis=0)        # (T, N)
    V = np.zeros((T, T * N), dtype=np.float64)
    for i in range(T):
        V[i, i * N:] = bpow[:T - i].reshape(-1)
    return V.astype(np.float32), P.astype(np.float32)


# ------------------------------ sizing helpers ----------------------------------

def _round_up(x, m):
    return ((x + m - 1) // m) * m


def _vmem_capacity_bytes():
    """Physical VMEM of the current chip; conservative 64 MiB fallback (v7x)."""
    default = 64 * 1024 * 1024
    try:
        fn = getattr(pltpu, "get_tpu_info", None)
        if fn is None:
            return default
        info = fn()
        for name in ("vmem_capacity_bytes", "vmem_size_bytes", "vmem_bytes"):
            val = getattr(info, name, None)
            if val:
                return int(val)
    except Exception:
        pass
    return default


def _pick_tile_m(M_pad, T, N, budget_bytes):
    """VMEM-budget driven choice of the M tile size (multiple of 8, divides M_pad)."""
    n_buf = _round_up(N, 128)          # lane-padded output / carry width in VMEM
    t_buf = _round_up(T, 128)          # lane-padded x width (conservative)
    tn = T * N
    resident = 2 * (T + N) * tn * 4    # V + P, double-buffered (default pipelining)

    cands = []
    for c in (M_pad, 4096, 2048, 1024, 512, 256, 128, 64, 32, 16, 8):
        if c <= M_pad and M_pad % c == 0 and c not in cands:
            cands.append(c)

    def need(tm):
        return (resident
                + 2 * tm * t_buf * 4          # x block, double-buffered
                + 2 * T * tm * n_buf * 4      # output block, double-buffered
                + tm * n_buf * 4)             # carry scratch

    fitting = [tm for tm in cands if need(tm) <= budget_bytes]
    if not fitting:
        return cands[-1] if cands else 8
    # Prefer >=2 M tiles (so the "parallel" axis can shard across v7x's two
    # TensorCores) as long as we don't drop below 128-row matmuls.
    for tm in fitting:
        if tm >= 128 and M_pad // tm >= 2:
            return tm
    return fitting[0]


# ----------------------------- Pallas kernel -----------------------------------

def hippo_chunk_kernel(x_ref, v_ref, p_ref, o_ref, c_ref):
    # x_ref : (TM, T)       inputs for this M tile / time chunk
    # v_ref : (T, T*N)      input -> state operator (resident across the grid)
    # p_ref : (N, T*N)      carry -> state operator (resident across the grid)
    # o_ref : (T, TM, N)    states for this chunk, ALREADY in final (time, m, N) order
    # c_ref : (TM, N)       recurrent carry (VMEM scratch, persists over the time axis)
    t_chunk, tm, n = o_ref.shape
    # Time sub-block: keeps each matmul ~256 output lanes so live values stay small.
    ts = math.gcd(t_chunk, max(1, 256 // max(n, 1)))

    @pl.when(pl.program_id(1) == 0)
    def _():
        c_ref[...] = jnp.zeros_like(c_ref)

    x = x_ref[...]           # (TM, T)
    c0 = c_ref[...]          # (TM, N)  carry at chunk start

    blk = None
    for s in range(t_chunk // ts):
        lo = s * ts * n
        hi = lo + ts * n
        blk = (jnp.dot(x, v_ref[:, lo:hi], preferred_element_type=jnp.float32)
               + jnp.dot(c0, p_ref[:, lo:hi], preferred_element_type=jnp.float32))
        # blk: (TM, ts*N); column block u is the state at local time s*ts + u.
        # Store each time step straight into the (time, m, N) output block, so the
        # wrapper never has to transpose the (L, M, N)-sized output in XLA.
        for u in range(ts):
            o_ref[s * ts + u] = blk[:, u * n:(u + 1) * n]

    # Carry for the next time chunk = state at the last local time step.
    c_ref[...] = blk[:, (ts - 1) * n:]


def hippo_legt_forward(inputs, Ad, Bd, max_chunk=128):
    """inputs: (d0, d1, L) float32; returns (L, d0, d1, N) float32."""
    d0, d1, L = inputs.shape
    N = int(Ad.shape[0])
    M = d0 * d1

    # ---- time-chunk size: either the whole (short) sequence, or a multiple of 128
    #      so the (TM, T) input block always satisfies the (8, 128) block rules.
    if L <= max(max_chunk, 1):
        T = L
    else:
        T = max(128, (max_chunk // 128) * 128)
    num_chunks = -(-L // T)
    L_pad = num_chunks * T

    # ---- M padding / tile size (VMEM-budget driven, generation aware)
    M_pad = _round_up(M, 8)
    if M_pad >= 128:
        M_pad = _round_up(M, 128)     # lets TM be 128/256/... instead of degrading to 8

    vmem_cap = _vmem_capacity_bytes()
    vmem_limit = int(min((vmem_cap * 3) // 4, 100 * 1024 * 1024))
    TM = _pick_tile_m(M_pad, T, N, (vmem_limit * 9) // 10)

    # ---- precomputed operators (float64 on host, stored float32)
    V, P = make_chunk_operators(Ad, Bd, T)
    V = jnp.asarray(V)
    P = jnp.asarray(P)

    # ---- inputs: reshape + zero-pad only; no transpose / repack (read as (TM, T) blocks)
    x2 = jnp.asarray(inputs, dtype=jnp.float32).reshape(M, L)
    if (M_pad != M) or (L_pad != L):
        x2 = jnp.pad(x2, ((0, M_pad - M), (0, L_pad - L)))

    out = pl.pallas_call(
        hippo_chunk_kernel,
        out_shape=jax.ShapeDtypeStruct((L_pad, M_pad, N), jnp.float32),
        grid_spec=pltpu.PrefetchScalarGridSpec(
            num_scalar_prefetch=0,
            grid=(M_pad // TM, num_chunks),        # (parallel M tiles, sequential time)
            in_specs=[
                pl.BlockSpec((TM, T), lambda m, t: (m, t)),      # x chunk
                pl.BlockSpec((T, T * N), lambda m, t: (0, 0)),   # V (resident)
                pl.BlockSpec((N, T * N), lambda m, t: (0, 0)),   # P (resident)
                # TODO(synk): pipeline_mode=pl.Buffered(1) on V/P would halve their
                # VMEM footprint on v7x; left at default buffering for portability.
            ],
            out_specs=pl.BlockSpec((T, TM, N), lambda m, t: (t, m, 0)),
            scratch_shapes=[pltpu.VMEM((TM, N), jnp.float32)],   # carry
        ),
        compiler_params=pltpu.CompilerParams(
            dimension_semantics=("parallel", "arbitrary"),       # time must stay sequential
            vmem_limit_bytes=vmem_limit,
        ),
    )(x2, V, P)

    # Output is already (L_pad, M_pad, N): only strip padding and do free reshapes.
    if (L_pad != L) or (M_pad != M):
        out = out[:L, :M]
    return out.reshape(L, d0, d1, N)


# -------------------------- pure-numpy reference --------------------------------

def ref_forward(inputs, Ad, Bd):
    d0, d1, L = inputs.shape
    N = Ad.shape[0]
    c = np.zeros((d0, d1, N), dtype=np.float64)
    cs = []
    A64 = np.asarray(Ad, dtype=np.float64)
    B64 = np.asarray(Bd, dtype=np.float64)
    x64 = np.asarray(inputs, dtype=np.float64)
    for t in range(L):
        f = x64[..., t][..., None]              # (d0, d1, 1)
        new = f * B64[None, None, :]            # (d0, d1, N)
        c = c @ A64.T + new
        cs.append(c)
    return np.stack(cs, axis=0).astype(np.float32)


# ------------------------------------ main ---------------------------------------

if __name__ == "__main__":
    N = 32          # HiPPO order
    d0, d1 = 2, 4
    key = jax.random.PRNGKey(0)
    k_small, k_long = jax.random.split(key)

    # --- small single-chunk case (L < 128 -> one time chunk) ---
    L = 8
    Ad, Bd = make_hippo_legt_params(N, dt=1.0 / L)
    x = jax.random.normal(k_small, (d0, d1, L), dtype=jnp.float32)
    out = jax.block_until_ready(hippo_legt_forward(x, Ad, Bd))
    assert out.shape == (L, d0, d1, N), out.shape
    np.testing.assert_allclose(np.asarray(out), ref_forward(np.asarray(x), Ad, Bd),
                               rtol=1e-3, atol=1e-3)

    # --- multi-chunk case exercising the carried recurrence (two T=128 chunks) ---
    L2 = 256
    Ad2, Bd2 = make_hippo_legt_params(N, dt=1.0 / L2)
    x_long = jax.random.normal(k_long, (d0, d1, L2), dtype=jnp.float32)
    out2 = jax.block_until_ready(hippo_legt_forward(x_long, Ad2, Bd2))
    assert out2.shape == (L2, d0, d1, N), out2.shape
    np.testing.assert_allclose(np.asarray(out2), ref_forward(np.asarray(x_long), Ad2, Bd2),
                               rtol=5e-3, atol=5e-3)

    print("KERNEL_OK")
</pallas_src>

<mosaic_0001>
module attributes {stable_mosaic.version = 11 : i64} {
  func.func @hippo_chunk_kernel(%arg0: i32, %arg1: i32, %arg2: memref<8x8xf32, #tpu.memory_space<vmem>>, %arg3: memref<8x256xf32, #tpu.memory_space<vmem>>, %arg4: memref<32x256xf32, #tpu.memory_space<vmem>>, %arg5: memref<8x8x32xf32, #tpu.memory_space<vmem>>, %arg6: memref<8x32xf32, #tpu.memory_space<vmem>>) attributes {dimension_semantics = [#tpu.dimension_semantics<parallel>, #tpu.dimension_semantics<arbitrary>], iteration_bounds = array<i64: 1, 1>, scalar_prefetch = 0 : i64, scratch_operands = 1 : i64, tpu.core_type = #tpu.core_type<tc>, window_params = [{transform_indices = @transform_0, window_bounds = array<i64: 8, 8>}, {pipeline_mode = #tpu.pipeline_mode<synchronous>, transform_indices = @transform_1, window_bounds = array<i64: 8, 256>}, {pipeline_mode = #tpu.pipeline_mode<synchronous>, transform_indices = @transform_2, window_bounds = array<i64: 32, 256>}, {transform_indices = @transform_3, window_bounds = array<i64: 8, 8, 32>}]} {
    %c0_i32 = arith.constant 0 : i32
    %0 = arith.cmpi eq, %arg1, %c0_i32 : i32
    %1 = arith.extui %0 : i1 to i32
    %c0_i32_0 = arith.constant 0 : i32
    %2 = arith.cmpi ne, %1, %c0_i32_0 : i32
    scf.if %2 {
      %cst_28 = arith.constant 0.000000e+00 : f32
      %44 = vector.broadcast %cst_28 : f32 to vector<8x32xf32>
      %c0_29 = arith.constant 0 : index
      %c0_30 = arith.constant 0 : index
      %45 = vector.load %arg6[%c0_29, %c0_30] : memref<8x32xf32, #tpu.memory_space<vmem>>, vector<8x32xf32>
      tpu.vector_store %arg6[%c0_29, %c0_30], %44 {strides = array<i32>} : memref<8x32xf32, #tpu.memory_space<vmem>>, vector<8x32xf32>,
    } else {
    }
    %c0 = arith.constant 0 : index
    %c0_1 = arith.constant 0 : index
    %3 = vector.load %arg2[%c0, %c0_1] : memref<8x8xf32, #tpu.memory_space<vmem>>, vector<8x8xf32>
    %c0_2 = arith.constant 0 : index
    %c0_3 = arith.constant 0 : index
    %4 = vector.load %arg6[%c0_2, %c0_3] : memref<8x32xf32, #tpu.memory_space<vmem>>, vector<8x32xf32>
    %c0_4 = arith.constant 0 : index
    %c0_5 = arith.constant 0 : index
    %5 = vector.load %arg3[%c0_4, %c0_5] : memref<8x256xf32, #tpu.memory_space<vmem>>, vector<8x256xf32>
    %cst = arith.constant dense<0.000000e+00> : vector<8x256xf32>
    %6 = tpu.matmul %3, %5, %cst {dimension_numbers = #tpu.dot_dimension_numbers<[1], [0], [0], [1], [0, 0, 1, 1], [], []>} : vector<8x8xf32>, vector<8x256xf32>, vector<8x256xf32> -> vector<8x256xf32>
    %c0_6 = arith.constant 0 : index
    %c0_7 = arith.constant 0 : index
    %7 = vector.load %arg4[%c0_6, %c0_7] : memref<32x256xf32, #tpu.memory_space<vmem>>, vector<32x256xf32>
    %cst_8 = arith.constant dense<0.000000e+00> : vector<8x256xf32>
    %8 = tpu.matmul %4, %7, %cst_8 {dimension_numbers = #tpu.dot_dimension_numbers<[1], [0], [0], [1], [0, 0, 1, 1], [], []>} : vector<8x32xf32>, vector<32x256xf32>, vector<8x256xf32> -> vector<8x256xf32>
    %9 = arith.addf %6, %8 : vector<8x256xf32>
    %10 = vector.extract_strided_slice %9 {offsets = [0, 0], sizes = [8, 32], strides = [1, 1]} : vector<8x256xf32> to vector<8x32xf32>
    %c0_9 = arith.constant 0 : index
    %c0_10 = arith.constant 0 : index
    %c0_11 = arith.constant 0 : index
    %11 = vector.load %arg5[%c0_9, %c0_10, %c0_11] : memref<8x8x32xf32, #tpu.memory_space<vmem>>, vector<1x8x32xf32>
    %12 = vector.shape_cast %11 : vector<1x8x32xf32> to vector<8x32xf32>
    %13 = vector.shape_cast %10 : vector<8x32xf32> to vector<1x8x32xf32>
    tpu.vector_store %arg5[%c0_9, %c0_10, %c0_11], %13 {strides = array<i32>} : memref<8x8x32xf32, #tpu.memory_space<vmem>>, vector<1x8x32xf32>,
    %14 = vector.extract_strided_slice %9 {offsets = [0, 32], sizes = [8, 32], strides = [1, 1]} : vector<8x256xf32> to vector<8x32xf32>
    %c1 = arith.constant 1 : index
    %c0_12 = arith.constant 0 : index
    %c0_13 = arith.constant 0 : index
    %15 = vector.load %arg5[%c1, %c0_12, %c0_13] : memref<8x8x32xf32, #tpu.memory_space<vmem>>, vector<1x8x32xf32>
    %16 = vector.shape_cast %15 : vector<1x8x32xf32> to vector<8x32xf32>
    %17 = vector.shape_cast %14 : vector<8x32xf32> to vector<1x8x32xf32>
    tpu.vector_store %arg5[%c1, %c0_12, %c0_13], %17 {strides = array<i32>} : memref<8x8x32xf32, #tpu.memory_space<vmem>>, vector<1x8x32xf32>,
    %18 = vector.extract_strided_slice %9 {offsets = [0, 64], sizes = [8, 32], strides = [1, 1]} : vector<8x256xf32> to vector<8x32xf32>
    %c2 = arith.constant 2 : index
    %c0_14 = arith.constant 0 : index
    %c0_15 = arith.constant 0 : index
    %19 = vector.load %arg5[%c2, %c0_14, %c0_15] : memref<8x8x32xf32, #tpu.memory_space<vmem>>, vector<1x8x32xf32>
    %20 = vector.shape_cast %19 : vector<1x8x32xf32> to vector<8x32xf32>
    %21 = vector.shape_cast %18 : vector<8x32xf32> to vector<1x8x32xf32>
    tpu.vector_store %arg5[%c2, %c0_14, %c0_15], %21 {strides = array<i32>} : memref<8x8x32xf32, #tpu.memory_space<vmem>>, vector<1x8x32xf32>,
    %22 = vector.extract_strided_slice %9 {offsets = [0, 96], sizes = [8, 32], strides = [1, 1]} : vector<8x256xf32> to vector<8x32xf32>
    %c3 = arith.constant 3 : index
    %c0_16 = arith.constant 0 : index
    %c0_17 = arith.constant 0 : index
    %23 = vector.load %arg5[%c3, %c0_16, %c0_17] : memref<8x8x32xf32, #tpu.memory_space<vmem>>, vector<1x8x32xf32>
    %24 = vector.shape_cast %23 : vector<1x8x32xf32> to vector<8x32xf32>
    %25 = vector.shape_cast %22 : vector<8x32xf32> to vector<1x8x32xf32>
    tpu.vector_store %arg5[%c3, %c0_16, %c0_17], %25 {strides = array<i32>} : memref<8x8x32xf32, #tpu.memory_space<vmem>>, vector<1x8x32xf32>,
    %26 = vector.extract_strided_slice %9 {offsets = [0, 128], sizes = [8, 32], strides = [1, 1]} : vector<8x256xf32> to vector<8x32xf32>
    %c4 = arith.constant 4 : index
    %c0_18 = arith.constant 0 : index
    %c0_19 = arith.constant 0 : index
    %27 = vector.load %arg5[%c4, %c0_18, %c0_19] : memref<8x8x32xf32, #tpu.memory_space<vmem>>, vector<1x8x32xf32>
    %28 = vector.shape_cast %27 : vector<1x8x32xf32> to vector<8x32xf32>
    %29 = vector.shape_cast %26 : vector<8x32xf32> to vector<1x8x32xf32>
    tpu.vector_store %arg5[%c4, %c0_18, %c0_19], %29 {strides = array<i32>} : memref<8x8x32xf32, #tpu.memory_space<vmem>>, vector<1x8x32xf32>,
    %30 = vector.extract_strided_slice %9 {offsets = [0, 160], sizes = [8, 32], strides = [1, 1]} : vector<8x256xf32> to vector<8x32xf32>
    %c5 = arith.constant 5 : index
    %c0_20 = arith.constant 0 : index
    %c0_21 = arith.constant 0 : index
    %31 = vector.load %arg5[%c5, %c0_20, %c0_21] : memref<8x8x32xf32, #tpu.memory_space<vmem>>, vector<1x8x32xf32>
    %32 = vector.shape_cast %31 : vector<1x8x32xf32> to vector<8x32xf32>
    %33 = vector.shape_cast %30 : vector<8x32xf32> to vector<1x8x32xf32>
    tpu.vector_store %arg5[%c5, %c0_20, %c0_21], %33 {strides = array<i32>} : memref<8x8x32xf32, #tpu.memory_space<vmem>>, vector<1x8x32xf32>,
    %34 = vector.extract_strided_slice %9 {offsets = [0, 192], sizes = [8, 32], strides = [1, 1]} : vector<8x256xf32> to vector<8x32xf32>
    %c6 = arith.constant 6 : index
    %c0_22 = arith.constant 0 : index
    %c0_23 = arith.constant 0 : index
    %35 = vector.load %arg5[%c6, %c0_22, %c0_23] : memref<8x8x32xf32, #tpu.memory_space<vmem>>, vector<1x8x32xf32>
    %36 = vector.shape_cast %35 : vector<1x8x32xf32> to vector<8x32xf32>
    %37 = vector.shape_cast %34 : vector<8x32xf32> to vector<1x8x32xf32>
    tpu.vector_store %arg5[%c6, %c0_22, %c0_23], %37 {strides = array<i32>} : memref<8x8x32xf32, #tpu.memory_space<vmem>>, vector<1x8x32xf32>,
    %38 = vector.extract_strided_slice %9 {offsets = [0, 224], sizes = [8, 32], strides = [1, 1]} : vector<8x256xf32> to vector<8x32xf32>
    %c7 = arith.constant 7 : index
    %c0_24 = arith.constant 0 : index
    %c0_25 = arith.constant 0 : index
    %39 = vector.load %arg5[%c7, %c0_24, %c0_25] : memref<8x8x32xf32, #tpu.memory_space<vmem>>, vector<1x8x32xf32>
    %40 = vector.shape_cast %39 : vector<1x8x32xf32> to vector<8x32xf32>
    %41 = vector.shape_cast %38 : vector<8x32xf32> to vector<1x8x32xf32>
    tpu.vector_store %arg5[%c7, %c0_24, %c0_25], %41 {strides = array<i32>} : memref<8x8x32xf32, #tpu.memory_space<vmem>>, vector<1x8x32xf32>,
    %42 = vector.extract_strided_slice %9 {offsets = [0, 224], sizes = [8, 32], strides = [1, 1]} : vector<8x256xf32> to vector<8x32xf32>
    %c0_26 = arith.constant 0 : index
    %c0_27 = arith.constant 0 : index
    %43 = vector.load %arg6[%c0_26, %c0_27] : memref<8x32xf32, #tpu.memory_space<vmem>>, vector<8x32xf32>
    tpu.vector_store %arg6[%c0_26, %c0_27], %42 {strides = array<i32>} : memref<8x32xf32, #tpu.memory_space<vmem>>, vector<8x32xf32>,
    return
  }
  func.func @transform_0(%arg0: i32, %arg1: i32) -> (i32, i32) {
    %c0_i32 = arith.constant 0 : i32
    return %arg0, %arg1 : i32, i32
  }
  func.func @transform_1(%arg0: i32, %arg1: i32) -> (i32, i32) {
    %c0_i32 = arith.constant 0 : i32
    %c0_i32_0 = arith.constant 0 : i32
    %c0_i32_1 = arith.constant 0 : i32
    return %c0_i32, %c0_i32_0 : i32, i32
  }
  func.func @transform_2(%arg0: i32, %arg1: i32) -> (i32, i32) {
    %c0_i32 = arith.constant 0 : i32
    %c0_i32_0 = arith.constant 0 : i32
    %c0_i32_1 = arith.constant 0 : i32
    return %c0_i32, %c0_i32_0 : i32, i32
  }
  func.func @transform_3(%arg0: i32, %arg1: i32) -> (i32, i32, i32) {
    %c0_i32 = arith.constant 0 : i32
    %c0_i32_0 = arith.constant 0 : i32
    return %arg1, %arg0, %c0_i32 : i32, i32, i32
  }
}

</mosaic_0001>

<bundles_post_ra>
// kernel: tpu_custom_call.1
= control target key start
LH: loop header
LB: loop body
LE: loop exit
PB: predicated region body
PF: predicated region fallthrough
CT: control target
= control target key end

     0   :  { %8 = vsyncpa [#allocation4], 0  ;;  %s483_s0 = inlined_call_operand.hbm [shape: f32[8,8], index: 0, kind: input, shape index: {}]   ;;  %s484_s1 = inlined_call_operand.hbm [shape: f32[8,256], index: 1, kind: input, shape index: {}]   ;;  %s485_s2 = inlined_call_operand.hbm [shape: f32[32,256], index: 2, kind: input, shape index: {}]   ;;  %s486_s3 = inlined_call_operand.hbm [shape: f32[8,8,32], index: 3, kind: output, shape index: {}]  }
   0x1   :  { %9 = vsyncpa [#allocation7], 0 }
   0x2   :  { %10 = vsyncpa [#allocation5], 0  ;;  %s392_s12 = smov [#allocation6]   ;;  %s393_s14 = smov [#allocation3]  }
   0x3   :  { %s27_s13 = sshll.u32 %s392_s12, 4  ;;  %s17_s15 = sshll.u32 %s393_s14, 4  ;;  %s28_s13 = int_to_ptr.vmem [resolvable:$true] %s27_s13  ;;  %s18_s15 = int_to_ptr.vmem [resolvable:$true] %s17_s15 }
   0x4   :  { %s298_s18 = scalar_lea.hbm %s484_s1, 256 }
   0x5   :  { %p299_p0 = scmp.ne.s32.totalorder %s484_s1, %s298_s18  ;;  %p302_p1 = scmp.lt.u32.totalorder %s298_s18, %s484_s1 }
   0x7   :  { %p304_p2 = pnand %p302_p1, %p299_p0 }
   0x9   :  { %307 = shalt.err (!%p304_p2)
}
   0xa   :  { %s308_s23 = scalar_lea.vmem %s28_s13, 256  ;;  %p313_p4 = scmp.lt.s32.totalorder %s28_s13, %s28_s13 }
   0xb   :  { %p309_p3 = scmp.ne.s32.totalorder %s28_s13, %s308_s23  ;;  %p314_p5 = scmp.lt.s32.totalorder %s308_s23, %s308_s23 }
   0xd   :  { %p315_p6 = por %p314_p5, %p313_p4 }
   0xf   :  { %p316_p7 = pnand %p315_p6, %p309_p3 }
  0x11   :  { %319 = shalt.err (!%p316_p7)
}
  0x12   :  { %30 = dma.hbm_to_vmem [thread:$0]  %s484_s1, 256, %s28_s13, [#allocation7]  }
  0x13   :  { %s320_s28 = scalar_lea.hbm %s483_s0, 128 }
  0x14   :  { %p321_p8 = scmp.ne.s32.totalorder %s483_s0, %s320_s28  ;;  %p324_p9 = scmp.lt.u32.totalorder %s320_s28, %s483_s0 }
  0x16   :  { %p326_p10 = pnand %p324_p9, %p321_p8 }
  0x18   :  { %329 = shalt.err (!%p326_p10)
}
  0x19   :  { %s330_s6 = scalar_lea.vmem %s18_s15, 128  ;;  %p335_p12 = scmp.lt.s32.totalorder %s18_s15, %s18_s15 }
  0x1a   :  { %p331_p11 = scmp.ne.s32.totalorder %s18_s15, %s330_s6  ;;  %p336_p13 = scmp.lt.s32.totalorder %s330_s6, %s330_s6 }
  0x1c   :  { %p337_p0 = por %p336_p13, %p335_p12 }
  0x1e   :  { %p338_p1 = pnand %p337_p0, %p331_p11 }
  0x20   :  { %341 = shalt.err (!%p338_p1)
}
  0x21   :  { %20 = dma.hbm_to_vmem [thread:$0]  %s483_s0, 128, %s18_s15, [#allocation4]  }
  0x22   :  { %s394_s8 = smov [#allocation8]   ;;  %s342_s12 = scalar_lea.hbm %s485_s2, 1024 }
  0x23   :  { %s36_s9 = sshll.u32 %s394_s8, 4  ;;  %p343_p2 = scmp.ne.s32.totalorder %s485_s2, %s342_s12  ;;  %s37_s9 = int_to_ptr.vmem [resolvable:$true] %s36_s9 }
  0x24   :  { %p346_p3 = scmp.lt.u32.totalorder %s342_s12, %s485_s2 }
  0x26   :  { %p348_p4 = pnand %p346_p3, %p343_p2 }
  0x28   :  { %351 = shalt.err (!%p348_p4)
}
  0x29   :  { %s352_s18 = scalar_lea.vmem %s37_s9, 1024  ;;  %p357_p6 = scmp.lt.s32.totalorder %s37_s9, %s37_s9 }
  0x2a   :  { %p353_p5 = scmp.ne.s32.totalorder %s37_s9, %s352_s18  ;;  %p358_p7 = scmp.lt.s32.totalorder %s352_s18, %s352_s18 }
  0x2c   :  { %p359_p8 = por %p358_p7, %p357_p6 }
  0x2e   :  { %p360_p9 = pnand %p359_p8, %p353_p5 }
  0x30   :  { %363 = shalt.err (!%p360_p9)
}
  0x31   :  { %s395_s0 = smov 256   ;;  %s396_s15 = smov 16  }
  0x32   :  { %42 = dma.hbm_to_vmem [thread:$0]  %s485_s2, 1024, %s37_s9, [#allocation7], %s395_s0, %s395_s0, %s396_s15  }
  0x33   :  { %386 = dma.done.wait [#allocation4], 128  }
  0x34   :  { %387 = vsyncadd [#allocation4], 4294967168 }
  0x35   :  { %388 = dma.done.wait [#allocation7], 1280  }
  0x36   :  { %389 = vsyncadd [#allocation7], 4294966016  ;;  %vm56_vm0 = vcmask 261120   ;;  %v397_v0 = vmov 0.0   ;;  %v63_v1 = vld [vmem:[#allocation8 + $0x8] sm:$0xff]  ;;  %v65_v2 = vld [vmem:[#allocation8 + $0x18] sm:$0xff] }
  0x37   :  { %57 = vst.msk [vmem:[#allocation2] sm:$0xff] %vm56_vm0, %v397_v0  ;;  %213 = vmatprep.mubr.f32.mxu0 %v397_v0  ;;  %138 = vmatprep.mubr.f32.mxu1 %v397_v0  ;;  %v62_v3 = vld [vmem:[#allocation8] sm:$0xff]  ;;  %v276_v4 = vpack.c.bf16 %v65_v2, %v63_v1  ;;  %v64_v5 = vld [vmem:[#allocation8 + $0x10] sm:$0xff]  ;;  %v67_v6 = vld [vmem:[#allocation8 + $0x28] sm:$0xff]  ;;  %vm145_vm1 = vcmask 64512   ;;  %s398_s2 = smov 32  }
  0x38   :  { %v69_v7 = vld [vmem:[#allocation8 + $0x38] sm:$0xff]  ;;  %v278_v8 = vpack.c.bf16 %v64_v5, %v62_v3  ;;  %v66_v10 = vld [vmem:[#allocation8 + $0x20] sm:$0xff]  ;;  %v68_v11 = vld [vmem:[#allocation8 + $0x30] sm:$0xff]  ;;  %s399_s21 = smov 96   ;;  %s400_s22 = smov 64  }
  0x39   :  { %v280_v9 = vpack.c.bf16 %v69_v7, %v67_v6  ;;  %v61_v12 = vld [vmem:[#allocation6 + $0x8] sm:$0xff]  ;;  %277 = vmatprep.subr.bf16.mxu1 %v276_v4  ;;  %v60_v13 = vld [vmem:[#allocation6] sm:$0xff]  ;;  %v58_v14 = vld [vmem:[#allocation3] sm:$0xff]  ;;  %v282_v15 = vpack.c.bf16 %v68_v11, %v66_v10  ;;  %s401_s23 = smov [#allocation9]  }
  0x3a   :  { %149 = vmatprep.subr.mxu0 %v61_v12  ;;  %279 = vmatpush1.bf16.msra.mxu1 %v278_v8  ;;  %s261_s24 = sshll.u32 %s401_s23, 4  ;;  %s262_s24 = int_to_ptr.vmem [resolvable:$true] %s261_s24 }
  0x3b   :  { %150 = vmatpush1.msra.mxu0 %v60_v13  ;;  %281 = vmatprep.subr.bf16.mxu1 %v280_v9  ;;  %s364_s25 = scalar_lea.vmem %s262_s24, 1024  ;;  %p369_p11 = scmp.lt.s32.totalorder %s262_s24, %s262_s24 }
  0x3c   :  { %275 = vmatmul.mubr.msk.f32.vlgmr.msra.gmra.mrb[0].mxu0 %vm145_vm1, %v58_v14  ;;  %p365_p10 = scmp.ne.s32.totalorder %s262_s24, %s364_s25  ;;  %p370_p12 = scmp.lt.s32.totalorder %s364_s25, %s364_s25 }
  0x3e   :  { %283 = vmatpush1.bf16.msra.mxu1 %v282_v15  ;;  %v59_v16 = vld [vmem:[#allocation2] sm:$0xff]  ;;  %p371_p13 = por %p370_p12, %p369_p11 }
  0x40   :  { %p372_p0 = pnand %p371_p13, %p365_p10 }
  0x41   :  { %274 = vmatmul.mubr.msk.f32.vlgmr.msra.gmra.mrb[0].mxu1 %vm56_vm0, %v59_v16 }
 0x10f   :  { %v215_v17 = vpop.f32.mrb[0].mxu0 }
 0x110   :  { %v217_v18 = vpop.f32.mrb[1].mxu0 }
 0x114   :  { %v140_v19 = vpop.f32.mrb[0].mxu1 }
 0x115   :  { %v216_v20 = vadd.f32 %v215_v17, %v140_v19  ;;  %v142_v21 = vpop.f32.mrb[1].mxu1 }
 0x116   :  { %v218_v22 = vadd.f32 %v217_v18, %v142_v21 }
 0x117   :  { %220 = vst.msk [vmem:[#allocation9] sm:$0xff] %vm56_vm0, %v216_v20  ;;  %232 = vrot.lane.b32.xlu1 %v216_v20, %s398_s2  ;;  %222 = vrot.lane.b32.xlu0 %v216_v20, %s399_s21 }
 0x118   :  { %238 = vst.msk [vmem:[#allocation9 + $0x20] sm:$0xff] %vm56_vm0, %v218_v22 }
 0x11b   :  { %227 = vrot.lane.b32.xlu0 %v216_v20, %s400_s22  ;;  %240 = vrot.lane.b32.xlu1 %v218_v22, %s399_s21 }
 0x11f   :  { %245 = vrot.lane.b32.xlu0 %v218_v22, %s400_s22  ;;  %250 = vrot.lane.b32.xlu1 %v218_v22, %s398_s2 }
 0x189   :  { %v233_v23 = vpop.permute.xlu1 %232  ;;  %v223_v24 = vpop.permute.xlu0 %222 }
 0x18a   :  { %236 = vst.msk [vmem:[#allocation9 + $0x18] sm:$0xff] %vm56_vm0, %v233_v23  ;;  %226 = vst.msk [vmem:[#allocation9 + $0x8] sm:$0xff] %vm56_vm0, %v223_v24 }
 0x18d   :  { %v228_v25 = vpop.permute.xlu0 %227  ;;  %v241_v26 = vpop.permute.xlu1 %240 }
 0x18e   :  { %231 = vst.msk [vmem:[#allocation9 + $0x10] sm:$0xff] %vm56_vm0, %v228_v25  ;;  %244 = vst.msk [vmem:[#allocation9 + $0x28] sm:$0xff] %vm56_vm0, %v241_v26 }
 0x191   :  { %v246_v27 = vpop.permute.xlu0 %245  ;;  %v251_v28 = vpop.permute.xlu1 %250 }
 0x192   :  { %249 = vst.msk [vmem:[#allocation9 + $0x30] sm:$0xff] %vm56_vm0, %v246_v27  ;;  %254 = vst.msk [vmem:[#allocation9 + $0x38] sm:$0xff] %vm56_vm0, %v251_v28 }
 0x193   :  { %255 = vst.msk [vmem:[#allocation2] sm:$0xff] %vm56_vm0, %v251_v28 }
 0x194   :  { %375 = shalt.err (!%p372_p0)
}
 0x195   :  { %s376_s28 = scalar_lea.hbm %s486_s3, 1024 }
 0x196   :  { %p377_p1 = scmp.ne.s32.totalorder %s486_s3, %s376_s28  ;;  %p380_p2 = scmp.lt.u32.totalorder %s376_s28, %s486_s3 }
 0x198   :  { %p382_p3 = pnand %p380_p2, %p377_p1 }
 0x19a   :  { %385 = shalt.err (!%p382_p3)
}
 0x19b   :  { %s402_s6 = smov 128   ;;  %s403_s1 = smov 8  }
 0x19c   :  { %267 = dma.vmem_to_hbm [thread:$0]  %s262_s24, 1024, %s486_s3, [#allocation5], %s402_s6, %s402_s6, %s403_s1  }
 0x19d   :  { %390 = dma.done.wait [#allocation5], 1024  }
 0x19e   :  { %391 = vsyncadd [#allocation5], 4294966272 }
 0x19f   :  { %271 = vsyncpa [#allocation4], 1 }
 0x1a0   :  { %272 = vsyncpa [#allocation7], 1 }
 0x1a1   :  { %273 = vsyncpa [#allocation5], 1 }

</bundles_post_ra>
